<compile_context>
chip_gen: v5e
topology: v5e:2x2
jax: 0.10.0
libtpu: 0.0.40
codegen_flags: <defaults>
</compile_context>

<pallas_src>
import functools

import numpy as np
import jax
import jax.numpy as jnp
from jax import lax
from jax.experimental import pallas as pl
from jax.experimental.pallas import tpu as pltpu


def _gaussian_kernel1d(kernel_size, sigma):
    """Exact separable factors of GaussianBlur._get_gaussian_kernel2d.

    Reproduces torch.linspace(-k // 2, k // 2, k) endpoint asymmetry
    ((-k)//2 .. k//2).  kernel2d[i, j] == wu[i] * wv[j] exactly.
    """
    kh, kw = kernel_size
    kx = np.linspace((-kh) // 2, kh // 2, kh, dtype=np.float32)
    ky = np.linspace((-kw) // 2, kw // 2, kw, dtype=np.float32)
    u = np.exp(-(kx ** 2) / (2.0 * sigma ** 2)).astype(np.float32)
    v = np.exp(-(ky ** 2) / (2.0 * sigma ** 2)).astype(np.float32)
    u = u / u.sum()
    v = v / v.sum()
    return tuple(float(a) for a in u), tuple(float(b) for b in v)


def _gaussian_kernel2d(kernel_size, sigma):
    """2D kernel exactly as the PyTorch module builds it (for the reference)."""
    kh, kw = kernel_size
    kx = np.linspace((-kh) // 2, kh // 2, kh, dtype=np.float32)
    ky = np.linspace((-kw) // 2, kw // 2, kw, dtype=np.float32)
    kxg, kyg = np.meshgrid(kx, ky, indexing="ij")
    kernel = np.exp(-(kxg ** 2 + kyg ** 2) / (2.0 * sigma ** 2))
    return (kernel / kernel.sum()).astype(np.float32)


def _blur_kernel(x_ref, o_ref, *, wu, wv, h, w):
    """Separable Gaussian blur of P flattened (H*W) planes per grid step.

    x_ref, o_ref : (P, H*W) blocks (native dtype), flat per-plane layout.
    wu (kh vertical taps) / wv (kw horizontal taps): Python float constants.
    """
    kh, kw = len(wu), len(wv)
    ph, pw = (kh - 1) // 2, (kw - 1) // 2
    L = h * w

    x = x_ref[...].astype(jnp.float32)                      # (P, L) f32
    col = lax.broadcasted_iota(jnp.int32, (1, L), 1)        # flat index in plane

    # ---- horizontal (kw-tap) pass: lane rolls + within-row boundary masks ----
    acc = x * wv[pw]
    if pw > 0:
        if (w & (w - 1)) == 0:                              # power-of-two width
            cmod = col & (w - 1)
        else:
            cmod = col % w
        for d in range(1, pw + 1):
            # source column c+d (flat p+d); zero past the right image edge
            fwd = pltpu.roll(x, shift=(L - d) % L, axis=1)
            acc = acc + jnp.where(cmod < w - d, fwd, 0.0) * wv[pw + d]
            # source column c-d (flat p-d); zero past the left image edge
            bwd = pltpu.roll(x, shift=d % L, axis=1)
            acc = acc + jnp.where(cmod >= d, bwd, 0.0) * wv[pw - d]

    # ---- vertical (kh-tap) pass: lane rolls by d*W + row-bound masks ---------
    out = acc * wu[ph]
    for d in range(1, ph + 1):
        dwn = pltpu.roll(acc, shift=(L - d * w) % L, axis=1)   # source row r+d
        out = out + jnp.where(col < (h - d) * w, dwn, 0.0) * wu[ph + d]
        up = pltpu.roll(acc, shift=(d * w) % L, axis=1)        # source row r-d
        out = out + jnp.where(col >= d * w, up, 0.0) * wu[ph - d]

    if jnp.issubdtype(o_ref.dtype, jnp.integer):
        out = jnp.rint(out)                                    # round, don't truncate
    o_ref[...] = out.astype(o_ref.dtype)


def _vmem_capacity_bytes():
    """Per-core VMEM capacity (generation aware), with a conservative fallback."""
    default = 64 * 1024 * 1024                                 # v7x per-TC VMEM (smallest)
    try:
        info = pltpu.get_tpu_info()
        for attr in ("vmem_capacity_bytes", "vmem_size_bytes", "vmem_bytes"):
            val = getattr(info, attr, None)
            if isinstance(val, (int, np.integer)) and val > 0:
                return int(val)
    except Exception:
        pass
    return default


def _round_up(a, m):
    return ((a + m - 1) // m) * m


def gaussian_blur(x, kernel_size=(3, 3), sigma=1.0):
    """Matches GaussianBlur(kernel_size, sigma)(x) for NCHW input (dtype preserved)."""
    b, c, h, w = x.shape
    kh, kw = kernel_size
    if kh % 2 != 1 or kw % 2 != 1:
        # The PyTorch module only supports odd kernel sizes (its final
        # .view(b, c, h, w) requires a same-size conv output).
        raise ValueError("GaussianBlur requires odd kernel sizes, got %s" % (kernel_size,))

    wu, wv = _gaussian_kernel1d(kernel_size, sigma)

    n = b * c
    L = h * w
    planes = x.reshape(n, L)                    # free reshape: flat, lane-dense planes
    in_bytes = planes.dtype.itemsize

    vmem_cap = _vmem_capacity_bytes()
    vmem_limit = int(vmem_cap * 0.85)           # explicit scoped-VMEM limit, per generation
    budget = max(8 << 20, int(vmem_cap * 0.40))  # per-step footprint target

    def footprint(p):
        blocks = 2 * 2 * p * L * in_bytes       # double-buffered input + output blocks
        temps = 4 * p * L * 4                   # live f32 intermediates (x, acc, out, roll tmp)
        return blocks + temps

    p_min = n if n <= 8 else 8                  # sublane block dim: multiple of 8 or full n
    if footprint(p_min) > vmem_limit:
        # TODO(synk): H-strip (row) halo tiling so very large single planes can be
        # split across VMEM blocks instead of erroring out.
        raise ValueError(
            "GaussianBlur Pallas kernel: %d plane(s) of %dx%d need ~%d MiB of VMEM "
            "(limit %d MiB); H-strip halo tiling not implemented."
            % (p_min, h, w, footprint(p_min) >> 20, vmem_limit >> 20))

    if n <= 8:
        P = n
    else:
        # Keep the grid >= 2 steps (v7x megacore sharding + DMA/compute overlap),
        # then grow P up to the VMEM budget.  No divisibility requirement on n.
        half8 = max(8, _round_up((n + 1) // 2, 8))
        p_cap = min(_round_up(n, 8), half8)
        P = 8
        for p in range(8, p_cap + 1, 8):
            if footprint(p) <= budget:
                P = p
            else:
                break

    grid = (pl.cdiv(n, P),)

    cost = pl.CostEstimate(
        flops=2 * n * L * (kh + kw),
        transcendentals=0,
        bytes_accessed=2 * n * L * in_bytes,
    )

    kernel_fn = functools.partial(_blur_kernel, wu=wu, wv=wv, h=h, w=w)

    # NOTE: pipeline_mode=pl.Buffered(3) on the input spec is a further knob if a
    # trace still shows exposed DMA after the large-tile fix; default 2 is kept.
    out = pl.pallas_call(
        kernel_fn,
        out_shape=jax.ShapeDtypeStruct((n, L), x.dtype),
        grid=grid,
        in_specs=[pl.BlockSpec((P, L), lambda i: (i, 0))],
        out_specs=pl.BlockSpec((P, L), lambda i: (i, 0)),
        compiler_params=pltpu.CompilerParams(
            dimension_semantics=("parallel",),
            vmem_limit_bytes=vmem_limit),
        cost_estimate=cost,
    )(planes)

    return out.reshape(b, c, h, w)


def _reference_blur(x, kernel_size=(3, 3), sigma=1.0):
    """Pure-numpy reference: same math as F.conv2d with zero padding (2D kernel)."""
    b, c, h, w = x.shape
    kh, kw = kernel_size
    ph, pw = (kh - 1) // 2, (kw - 1) // 2
    oh = h + 2 * ph - kh + 1
    ow = w + 2 * pw - kw + 1
    wk = _gaussian_kernel2d(kernel_size, sigma)
    xp = np.pad(np.asarray(x, dtype=np.float32).reshape(b * c, h, w),
                ((0, 0), (ph, ph), (pw, pw)))
    acc = np.zeros((b * c, oh, ow), np.float32)
    for i in range(kh):
        for j in range(kw):
            acc += xp[:, i:i + oh, j:j + ow] * wk[i, j]
    return acc.reshape(b, c, oh, ow)


if __name__ == "__main__":
    key = jax.random.PRNGKey(0)
    x = jax.random.uniform(key, (2, 4, 16, 16), dtype=jnp.float32)

    y = gaussian_blur(x, kernel_size=(3, 3), sigma=1.0)
    y = jax.block_until_ready(y)

    assert y.shape == (2, 4, 16, 16), y.shape
    assert y.dtype == x.dtype, y.dtype
    y_ref = _reference_blur(x, (3, 3), 1.0)
    np.testing.assert_allclose(np.asarray(y), y_ref, rtol=1e-5, atol=1e-5)

    print("KERNEL_OK")
</pallas_src>

<mosaic_0001>
module attributes {stable_mosaic.version = 11 : i64} {
  func.func @_blur_kernel(%arg0: i32, %arg1: memref<8x256xf32, #tpu.memory_space<vmem>>, %arg2: memref<8x256xf32, #tpu.memory_space<vmem>>) attributes {dimension_semantics = [#tpu.dimension_semantics<parallel>], iteration_bounds = array<i64: 1>, scalar_prefetch = 0 : i64, scratch_operands = 0 : i64, tpu.core_type = #tpu.core_type<tc>, window_params = [{transform_indices = @transform_0, window_bounds = array<i64: 8, 256>}, {transform_indices = @transform_1, window_bounds = array<i64: 8, 256>}]} {
    %c0 = arith.constant 0 : index
    %c0_0 = arith.constant 0 : index
    %0 = vector.load %arg1[%c0, %c0_0] : memref<8x256xf32, #tpu.memory_space<vmem>>, vector<8x256xf32>
    %1 = tpu.iota {dimensions = array<i32: 1>} : vector<1x256xi32>
    %cst = arith.constant 0.543288052 : f32
    %2 = vector.broadcast %cst : f32 to vector<8x256xf32>
    %3 = arith.mulf %0, %2 : vector<8x256xf32>
    %c15_i32 = arith.constant 15 : i32
    %4 = vector.broadcast %c15_i32 : i32 to vector<1x256xi32>
    %5 = arith.andi %1, %4 : vector<1x256xi32>
    %c255_i32 = arith.constant 255 : i32
    %6 = tpu.dynamic_rotate %0 by %c255_i32 dim 1 : vector<8x256xf32>, i32 -> vector<8x256xf32>
    %c15_i32_1 = arith.constant 15 : i32
    %7 = vector.broadcast %c15_i32_1 : i32 to vector<1x256xi32>
    %8 = arith.cmpi slt, %5, %7 : vector<1x256xi32>
    %cst_2 = arith.constant 0.000000e+00 : f32
    %9 = vector.shape_cast %8 : vector<1x256xi1> to vector<1x256xi1>
    %10 = vector.broadcast %9 : vector<1x256xi1> to vector<8x256xi1>
    %11 = vector.broadcast %cst_2 : f32 to vector<8x256xf32>
    %12 = arith.select %10, %6, %11 : vector<8x256xi1>, vector<8x256xf32>
    %cst_3 = arith.constant 0.373396039 : f32
    %13 = vector.broadcast %cst_3 : f32 to vector<8x256xf32>
    %14 = arith.mulf %12, %13 : vector<8x256xf32>
    %15 = arith.addf %3, %14 : vector<8x256xf32>
    %c1_i32 = arith.constant 1 : i32
    %16 = tpu.dynamic_rotate %0 by %c1_i32 dim 1 : vector<8x256xf32>, i32 -> vector<8x256xf32>
    %c1_i32_4 = arith.constant 1 : i32
    %17 = vector.broadcast %c1_i32_4 : i32 to vector<1x256xi32>
    %18 = arith.cmpi sge, %5, %17 : vector<1x256xi32>
    %cst_5 = arith.constant 0.000000e+00 : f32
    %19 = vector.shape_cast %18 : vector<1x256xi1> to vector<1x256xi1>
    %20 = vector.broadcast %19 : vector<1x256xi1> to vector<8x256xi1>
    %21 = vector.broadcast %cst_5 : f32 to vector<8x256xf32>
    %22 = arith.select %20, %16, %21 : vector<8x256xi1>, vector<8x256xf32>
    %cst_6 = arith.constant 0.0833159163 : f32
    %23 = vector.broadcast %cst_6 : f32 to vector<8x256xf32>
    %24 = arith.mulf %22, %23 : vector<8x256xf32>
    %25 = arith.addf %15, %24 : vector<8x256xf32>
    %cst_7 = arith.constant 0.543288052 : f32
    %26 = vector.broadcast %cst_7 : f32 to vector<8x256xf32>
    %27 = arith.mulf %25, %26 : vector<8x256xf32>
    %c240_i32 = arith.constant 240 : i32
    %28 = tpu.dynamic_rotate %25 by %c240_i32 dim 1 : vector<8x256xf32>, i32 -> vector<8x256xf32>
    %c240_i32_8 = arith.constant 240 : i32
    %29 = vector.broadcast %c240_i32_8 : i32 to vector<1x256xi32>
    %30 = arith.cmpi slt, %1, %29 : vector<1x256xi32>
    %cst_9 = arith.constant 0.000000e+00 : f32
    %31 = vector.shape_cast %30 : vector<1x256xi1> to vector<1x256xi1>
    %32 = vector.broadcast %31 : vector<1x256xi1> to vector<8x256xi1>
    %33 = vector.broadcast %cst_9 : f32 to vector<8x256xf32>
    %34 = arith.select %32, %28, %33 : vector<8x256xi1>, vector<8x256xf32>
    %cst_10 = arith.constant 0.373396039 : f32
    %35 = vector.broadcast %cst_10 : f32 to vector<8x256xf32>
    %36 = arith.mulf %34, %35 : vector<8x256xf32>
    %37 = arith.addf %27, %36 : vector<8x256xf32>
    %c16_i32 = arith.constant 16 : i32
    %38 = tpu.dynamic_rotate %25 by %c16_i32 dim 1 : vector<8x256xf32>, i32 -> vector<8x256xf32>
    %c16_i32_11 = arith.constant 16 : i32
    %39 = vector.broadcast %c16_i32_11 : i32 to vector<1x256xi32>
    %40 = arith.cmpi sge, %1, %39 : vector<1x256xi32>
    %cst_12 = arith.constant 0.000000e+00 : f32
    %41 = vector.shape_cast %40 : vector<1x256xi1> to vector<1x256xi1>
    %42 = vector.broadcast %41 : vector<1x256xi1> to vector<8x256xi1>
    %43 = vector.broadcast %cst_12 : f32 to vector<8x256xf32>
    %44 = arith.select %42, %38, %43 : vector<8x256xi1>, vector<8x256xf32>
    %cst_13 = arith.constant 0.0833159163 : f32
    %45 = vector.broadcast %cst_13 : f32 to vector<8x256xf32>
    %46 = arith.mulf %44, %45 : vector<8x256xf32>
    %47 = arith.addf %37, %46 : vector<8x256xf32>
    %c0_14 = arith.constant 0 : index
    %c0_15 = arith.constant 0 : index
    %48 = vector.load %arg2[%c0_14, %c0_15] : memref<8x256xf32, #tpu.memory_space<vmem>>, vector<8x256xf32>
    tpu.vector_store %arg2[%c0_14, %c0_15], %47 {strides = array<i32>} : memref<8x256xf32, #tpu.memory_space<vmem>>, vector<8x256xf32>,
    return
  }
  func.func @transform_0(%arg0: i32) -> (i32, i32) {
    %c0_i32 = arith.constant 0 : i32
    %c0_i32_0 = arith.constant 0 : i32
    return %arg0, %c0_i32 : i32, i32
  }
  func.func @transform_1(%arg0: i32) -> (i32, i32) {
    %c0_i32 = arith.constant 0 : i32
    %c0_i32_0 = arith.constant 0 : i32
    return %arg0, %c0_i32 : i32, i32
  }
}

</mosaic_0001>

<bundles_post_ra>
// kernel: tpu_custom_call.1
= control target key start
LH: loop header
LB: loop body
LE: loop exit
PB: predicated region body
PF: predicated region fallthrough
CT: control target
= control target key end

     0   :  { %6 = vsyncpa [#allocation3], 0  ;;  %s221_s0 = inlined_call_operand.hbm [shape: f32[8,256], index: 0, kind: input, shape index: {}]   ;;  %s222_s1 = inlined_call_operand.hbm [shape: f32[8,256], index: 1, kind: output, shape index: {}]  }
   0x1   :  { %7 = vsyncpa [#allocation4], 0  ;;  %s13_s8 = sshll.u32 %s221_s0, 4  ;;  %s187_s9 = smov [#allocation2]   ;;  %s14_s8 = int_to_ptr.hbm [resolvable:$true] %s13_s8 }
   0x2   :  { %s15_s10 = sshll.u32 %s187_s9, 4  ;;  %s16_s10 = int_to_ptr.vmem [resolvable:$true] %s15_s10 }
   0x3   :  { %18 = dma.hbm_to_vmem [thread:$0]  %s14_s8, 256, %s16_s10, [#allocation3]  }
   0x4   :  { %183 = dma.done.wait [#allocation3], 256  }
   0x5   :  { %184 = vsyncadd [#allocation3], 4294967040  ;;  %v23_v0 = vld [vmem:[#allocation2] sm:$0xff]  ;;  %s188_s11 = smov 1   ;;  %s189_s12 = smov 127   ;;  %v24_v1 = vld [vmem:[#allocation2 + $0x8] sm:$0xff]  ;;  %v25_v2 = vlaneseq }
   0x6   :  { %51 = vrot.lane.b32.xlu1 %v23_v0, %s188_s11  ;;  %32 = vrot.lane.b32.xlu0 %v23_v0, %s189_s12  ;;  %v28_v10 = vmul.f32 0.54328805, %v23_v0  ;;  %v29_v18 = vmul.f32 0.54328805, %v24_v1  ;;  %s190_s0 = smov 16   ;;  %s191_s13 = smov 112  }
   0x7   :  { %v26_v3 = vand.u32 127, %v25_v2  ;;  %s192_s14 = smov [#allocation5]   ;;  %s119_s18 = sshll.u32 %s222_s1, 4  ;;  %s120_s18 = int_to_ptr.hbm [resolvable:$true] %s119_s18 }
   0x8   :  { %s117_s15 = sshll.u32 %s192_s14, 4  ;;  %s118_s15 = int_to_ptr.vmem [resolvable:$true] %s117_s15 }
   0x9   :  { %v27_v4 = vadd.s32 128, %v26_v3  ;;  %v30_v7 = vand.u32 15, %v26_v3  ;;  %vm55_vm0 = vcmp.lt.s32.totalorder %v26_v3, 1  ;;  %vm36_vm1 = vcmp.lt.s32.totalorder %v26_v3, 127 }
   0xa   :  { %vm76_vm6 = vcmp.lt.s32.totalorder %v26_v3, 112  ;;  %vm95_vm8 = vcmp.lt.s32.totalorder %v26_v3, 16  ;;  %vm98_vm9 = vcmp.ge.s32.totalorder %v26_v3, 16 }
   0xb   :  { %v31_v8 = vand.u32 15, %v27_v4  ;;  %vm206_vm2 = vcmp.ge.s32.totalorder %v30_v7, 1  ;;  %vm39_vm3 = vcmp.lt.s32.totalorder %v30_v7, 15  ;;  %vm80_vm7 = vcmp.lt.s32.totalorder %v27_v4, 240 }
   0xd   :  { %vm40_vm4 = vcmp.lt.s32.totalorder %v31_v8, 15  ;;  %vm210_vm5 = vcmp.ge.s32.totalorder %v31_v8, 1 }
   0xe   :  { %53 = vrot.lane.b32.xlu1 %v24_v1, %s188_s11  ;;  %34 = vrot.lane.b32.xlu0 %v24_v1, %s189_s12 }
  0x78   :  { %v52_v5 = vpop.permute.xlu1 %51  ;;  %v33_v6 = vpop.permute.xlu0 %32 }
  0x80   :  { %v54_v12 = vpop.permute.xlu1 %53  ;;  %v35_v13 = vpop.permute.xlu0 %34 }
  0x81   :  { %v56_v14 = vsel %vm55_vm0, %v52_v5, %v54_v12  ;;  %v57_v15 = vsel %vm55_vm0, %v54_v12, %v52_v5  ;;  %v37_v16 = vsel %vm36_vm1, %v33_v6, %v35_v13  ;;  %v38_v17 = vsel %vm36_vm1, %v35_v13, %v33_v6 }
  0x82   :  { %v64_v19 = vsel %vm206_vm2, %v57_v15, 0.0  ;;  %v45_v20 = vsel %vm39_vm3, %v37_v16, 0.0  ;;  %v46_v21 = vsel %vm40_vm4, %v38_v17, 0.0  ;;  %v65_v22 = vsel %vm210_vm5, %v56_v14, 0.0 }
  0x83   :  { %v47_v23 = vmul.f32 0.37339604, %v45_v20  ;;  %v48_v24 = vmul.f32 0.37339604, %v46_v21  ;;  %v66_v25 = vmul.f32 0.08331592, %v64_v19 }
  0x84   :  { %v67_v27 = vmul.f32 0.08331592, %v65_v22 }
  0x85   :  { %v49_v26 = vadd.f32 %v47_v23, %v28_v10  ;;  %v50_v28 = vadd.f32 %v48_v24, %v29_v18 }
  0x87   :  { %v68_v29 = vadd.f32 %v66_v25, %v49_v26  ;;  %v69_v30 = vadd.f32 %v67_v27, %v50_v28 }
  0x89   :  { %91 = vrot.lane.b32.xlu0 %v68_v29, %s190_s0  ;;  %72 = vrot.lane.b32.xlu2 %v68_v29, %s191_s13  ;;  %v71_v39 = vmul.f32 0.54328805, %v69_v30  ;;  %v70_v41 = vmul.f32 0.54328805, %v68_v29 }
  0x8a   :  { %93 = vrot.lane.b32.xlu1 %v69_v30, %s190_s0 }
  0x91   :  { %74 = vrot.lane.b32.xlu2 %v69_v30, %s191_s13 }
  0xe3   :  { %v73_v31 = vpop.permute.xlu2 %72 }
  0xeb   :  { %v75_v32 = vpop.permute.xlu2 %74 }
  0xec   :  { %v78_v33 = vsel %vm76_vm6, %v75_v32, %v73_v31  ;;  %v77_v35 = vsel %vm76_vm6, %v73_v31, %v75_v32 }
  0xed   :  { %v86_v34 = vsel %vm80_vm7, %v78_v33, 0.0  ;;  %v87_v37 = vmul.f32 0.37339604, %v77_v35 }
  0xee   :  { %v88_v36 = vmul.f32 0.37339604, %v86_v34 }
  0xef   :  { %v89_v47 = vadd.f32 %v87_v37, %v70_v41 }
  0xf0   :  { %v90_v44 = vadd.f32 %v88_v36, %v71_v39 }
  0xfb   :  { %v92_v38 = vpop.permute.xlu0 %91 }
  0xfc   :  { %v94_v40 = vpop.permute.xlu1 %93 }
  0xfd   :  { %v96_v42 = vsel %vm95_vm8, %v92_v38, %v94_v40  ;;  %v97_v43 = vsel %vm95_vm8, %v94_v40, %v92_v38 }
  0xfe   :  { %v104_v45 = vsel %vm98_vm9, %v97_v43, 0.0  ;;  %v107_v46 = vmul.f32 0.08331592, %v96_v42 }
  0xff   :  { %v106_v48 = vmul.f32 0.08331592, %v104_v45 }
 0x100   :  { %v109_v49 = vadd.f32 %v107_v46, %v90_v44 }
 0x101   :  { %v108_v50 = vadd.f32 %v106_v48, %v89_v47 }
 0x102   :  { %111 = vst [vmem:[#allocation5 + $0x8] sm:$0xff] %v109_v49 }
 0x103   :  { %110 = vst [vmem:[#allocation5] sm:$0xff] %v108_v50 }
 0x104   :  { %122 = dma.vmem_to_hbm [thread:$0]  %s118_s15, 256, %s120_s18, [#allocation4]  }
 0x105   :  { %185 = dma.done.wait [#allocation4], 256  }
 0x106   :  { %186 = vsyncadd [#allocation4], 4294967040 }
 0x107   :  { %127 = vsyncpa [#allocation3], 1 }
 0x108   :  { %128 = vsyncpa [#allocation4], 1 }

</bundles_post_ra>
